<compile_context>
chip_gen: v7x
topology: tpu7x:2x2x1
jax: 0.10.0
libtpu: 0.0.40
codegen_flags: <defaults>
</compile_context>

<pallas_src>
import functools

import jax
import jax.numpy as jnp
from jax.experimental import pallas as pl
from jax.experimental.pallas import tpu as pltpu

EPS = 1e-5
VMEM_LIMIT = 32 * 1024 * 1024  # safe on v5e/v6e/v7x


# ----------------------------- Pallas kernels --------------------------------
def conv_stats_kernel(w_ref, p_ref, y_ref, sum_ref, sq_ref):
    """y_t tile = W_t @ patches_t tile; accumulate per-channel sum / sumsq."""
    # Init the resident (Cout, 1) accumulators on the first grid step.
    @pl.when(pl.program_id(0) == 0)
    def _():
        sum_ref[...] = jnp.zeros_like(sum_ref)
        sq_ref[...] = jnp.zeros_like(sq_ref)

    # (Cout, K) @ (K, TILE_M) -> (Cout, TILE_M), bf16 in, f32 accumulate.
    y = jnp.dot(w_ref[...], p_ref[...], preferred_element_type=jnp.float32)
    y_ref[...] = y

    # Per-channel partial sums over this tile (lane-axis reduce -> XLU slot).
    sum_ref[...] += jnp.sum(y, axis=1, keepdims=True)
    sq_ref[...] += jnp.sum(y * y, axis=1, keepdims=True)


def bn_relu_kernel(y_ref, sum_ref, sq_ref, gamma_ref, beta_ref, o_ref, *, m_total):
    """Training-mode BatchNorm (biased var) + affine + ReLU on a lane-dense tile."""
    inv_m = jnp.float32(1.0 / m_total)
    mean = sum_ref[...] * inv_m                       # (Cout, 1)
    var = sq_ref[...] * inv_m - mean * mean           # biased variance, f32
    scale = gamma_ref[...] * jax.lax.rsqrt(var + EPS)
    shift = beta_ref[...] - mean * scale
    o_ref[...] = jnp.maximum(y_ref[...] * scale + shift, 0.0)


# ------------------------------- wrappers -------------------------------------
def _pick_tile_m(m):
    # Largest convenient lane-aligned tile; prefer >= 2 grid steps for pipelining.
    for t in (2048, 1024, 512, 256, 128):
        if m % t == 0 and m // t >= 2:
            return t
    for t in (2048, 1024, 512, 256, 128):
        if m % t == 0:
            return t
    return m


def conv_bn_relu_t(patches_t, w_t, gamma, beta):
    """patches_t: (K, M) f32, w_t: (Cout, K) f32 -> (Cout, M) f32 (post BN+ReLU)."""
    k, m = patches_t.shape
    c_out = w_t.shape[0]
    tile_m = _pick_tile_m(m)
    grid = (m // tile_m,)

    stat_spec = pl.BlockSpec((c_out, 1), lambda j: (0, 0))

    # ---- pass 1: conv matmul + global per-channel sum / sumsq -----------------
    y_t, ch_sum, ch_sq = pl.pallas_call(
        conv_stats_kernel,
        out_shape=(
            jax.ShapeDtypeStruct((c_out, m), jnp.float32),
            jax.ShapeDtypeStruct((c_out, 1), jnp.float32),
            jax.ShapeDtypeStruct((c_out, 1), jnp.float32),
        ),
        grid=grid,
        in_specs=[
            pl.BlockSpec((c_out, k), lambda j: (0, 0)),       # weights, resident
            pl.BlockSpec((k, tile_m), lambda j: (0, j)),      # patches tile
        ],
        out_specs=(
            pl.BlockSpec((c_out, tile_m), lambda j: (0, j)),  # conv output tile
            stat_spec,                                        # resident accumulators
            stat_spec,
        ),
        compiler_params=pltpu.CompilerParams(
            dimension_semantics=("arbitrary",),   # global-stat accumulation over M
            vmem_limit_bytes=VMEM_LIMIT,
        ),
        cost_estimate=pl.CostEstimate(
            flops=2 * m * k * c_out,
            transcendentals=0,
            bytes_accessed=2 * k * m + 2 * c_out * k + 4 * c_out * m,
        ),
    )(w_t.astype(jnp.bfloat16), patches_t.astype(jnp.bfloat16))

    # ---- pass 2: normalize + gamma/beta + ReLU (embarrassingly parallel) ------
    out_t = pl.pallas_call(
        functools.partial(bn_relu_kernel, m_total=float(m)),
        out_shape=jax.ShapeDtypeStruct((c_out, m), jnp.float32),
        grid=grid,
        in_specs=[
            pl.BlockSpec((c_out, tile_m), lambda j: (0, j)),
            stat_spec, stat_spec, stat_spec, stat_spec,
        ],
        out_specs=pl.BlockSpec((c_out, tile_m), lambda j: (0, j)),
        compiler_params=pltpu.CompilerParams(
            dimension_semantics=("parallel",),
            vmem_limit_bytes=VMEM_LIMIT,
        ),
        cost_estimate=pl.CostEstimate(
            flops=2 * c_out * m,
            transcendentals=c_out,
            bytes_accessed=8 * c_out * m,
        ),
    )(y_t, ch_sum, ch_sq, gamma.reshape(c_out, 1), beta.reshape(c_out, 1))

    return out_t


# ------------------------------- JAX glue ------------------------------------
def im2col_3x3_same_t(x_nhwc):
    """(N, H, W, C) -> (9*C, N*H*W); patch order (ky, kx) outer, channel inner."""
    n, h, w, c = x_nhwc.shape
    xp = jnp.pad(x_nhwc, ((0, 0), (1, 1), (1, 1), (0, 0)))
    cols = []
    for ky in range(3):
        for kx in range(3):
            cols.append(xp[:, ky:ky + h, kx:kx + w, :])       # (N, H, W, C)
    patches = jnp.stack(cols, axis=0)                         # (9, N, H, W, C)
    patches = jnp.transpose(patches, (0, 4, 1, 2, 3))         # (9, C, N, H, W)
    return patches.reshape(9 * c, n * h * w)


def conv_weight_to_mat_t(w_oihw):
    """PyTorch (Cout, Cin, 3, 3) -> (Cout, 9*Cin) matching im2col_3x3_same_t."""
    c_out, c_in, _, _ = w_oihw.shape
    return jnp.transpose(w_oihw, (0, 2, 3, 1)).reshape(c_out, 9 * c_in)


@jax.jit
def conv_block_forward(x_nchw, params):
    """ConvBlock forward.  x: (N, Cin, H, W) -> (N, Cout, H, W), float32."""
    w1, b1, g1, be1, w2, b2, g2, be2 = params
    del b1, b2  # conv bias is exactly cancelled by BatchNorm mean subtraction
    n, _, h, w = x_nchw.shape
    c_out = w1.shape[0]

    x_nhwc = jnp.transpose(x_nchw, (0, 2, 3, 1)).astype(jnp.float32)

    # conv1 + bn1 + relu
    p1 = im2col_3x3_same_t(x_nhwc)                            # (9*Cin, M)
    y1_t = conv_bn_relu_t(p1, conv_weight_to_mat_t(w1), g1, be1)   # (Cout, M)
    y1_nhwc = jnp.transpose(y1_t.reshape(c_out, n, h, w), (1, 2, 3, 0))

    # conv2 + bn2 + relu
    p2 = im2col_3x3_same_t(y1_nhwc)                           # (9*Cout, M)
    y2_t = conv_bn_relu_t(p2, conv_weight_to_mat_t(w2), g2, be2)   # (Cout, M)

    return jnp.transpose(y2_t.reshape(c_out, n, h, w), (1, 0, 2, 3))  # NCHW


# --------------------------- pure-JAX reference -------------------------------
def _ref_bn_relu(y_nchw, gamma, beta):
    mean = jnp.mean(y_nchw, axis=(0, 2, 3), keepdims=True)
    var = jnp.mean((y_nchw - mean) ** 2, axis=(0, 2, 3), keepdims=True)
    yn = (y_nchw - mean) * jax.lax.rsqrt(var + EPS)
    yn = yn * gamma.reshape(1, -1, 1, 1) + beta.reshape(1, -1, 1, 1)
    return jnp.maximum(yn, 0.0)


def conv_block_reference(x_nchw, params):
    w1, b1, g1, be1, w2, b2, g2, be2 = params
    dn = ('NCHW', 'OIHW', 'NCHW')
    y = jax.lax.conv_general_dilated(x_nchw, w1, (1, 1), 'SAME',
                                     dimension_numbers=dn)
    y = y + b1.reshape(1, -1, 1, 1)
    y = _ref_bn_relu(y, g1, be1)
    y = jax.lax.conv_general_dilated(y, w2, (1, 1), 'SAME',
                                     dimension_numbers=dn)
    y = y + b2.reshape(1, -1, 1, 1)
    y = _ref_bn_relu(y, g2, be2)
    return y


# ---------------------------------- main --------------------------------------
if __name__ == "__main__":
    N, C_IN, C_OUT, H, W = 2, 4, 8, 16, 16

    key = jax.random.PRNGKey(0)
    kx, kw1, kb1, kw2, kb2 = jax.random.split(key, 5)

    x = jax.random.normal(kx, (N, C_IN, H, W), dtype=jnp.float32)

    # Parameter shapes follow nn.Conv2d / nn.BatchNorm2d defaults.
    w1 = 0.1 * jax.random.normal(kw1, (C_OUT, C_IN, 3, 3), dtype=jnp.float32)
    b1 = 0.1 * jax.random.normal(kb1, (C_OUT,), dtype=jnp.float32)
    g1 = jnp.ones((C_OUT,), jnp.float32)       # BatchNorm weight default = 1
    be1 = jnp.zeros((C_OUT,), jnp.float32)     # BatchNorm bias   default = 0
    w2 = 0.1 * jax.random.normal(kw2, (C_OUT, C_OUT, 3, 3), dtype=jnp.float32)
    b2 = 0.1 * jax.random.normal(kb2, (C_OUT,), dtype=jnp.float32)
    g2 = jnp.ones((C_OUT,), jnp.float32)
    be2 = jnp.zeros((C_OUT,), jnp.float32)

    params = (w1, b1, g1, be1, w2, b2, g2, be2)

    out = jax.block_until_ready(conv_block_forward(x, params))
    assert out.shape == (N, C_OUT, H, W), out.shape

    ref = jax.block_until_ready(conv_block_reference(x, params))
    # bf16 MXU inputs (f32 accumulate / f32 BN) -> tolerance set accordingly.
    max_err = float(jnp.max(jnp.abs(out - ref)))
    assert jnp.allclose(out, ref, atol=3e-2, rtol=3e-2), max_err

    print("KERNEL_OK")
</pallas_src>

<mosaic_0001>
module attributes {stable_mosaic.version = 11 : i64} {
  func.func @conv_stats_kernel(%arg0: i32, %arg1: memref<8x36xbf16, #tpu.memory_space<vmem>>, %arg2: memref<36x256xbf16, #tpu.memory_space<vmem>>, %arg3: memref<8x256xf32, #tpu.memory_space<vmem>>, %arg4: memref<8x1xf32, #tpu.memory_space<vmem>>, %arg5: memref<8x1xf32, #tpu.memory_space<vmem>>) attributes {dimension_semantics = [#tpu.dimension_semantics<arbitrary>], iteration_bounds = array<i64: 2>, scalar_prefetch = 0 : i64, scratch_operands = 0 : i64, tpu.core_type = #tpu.core_type<tc>, window_params = [{pipeline_mode = #tpu.pipeline_mode<synchronous>, transform_indices = @transform_0, window_bounds = array<i64: 8, 36>}, {transform_indices = @transform_1, window_bounds = array<i64: 36, 256>}, {transform_indices = @transform_2, window_bounds = array<i64: 8, 256>}, {pipeline_mode = #tpu.pipeline_mode<synchronous>, transform_indices = @transform_3, window_bounds = array<i64: 8, 1>}, {pipeline_mode = #tpu.pipeline_mode<synchronous>, transform_indices = @transform_4, window_bounds = array<i64: 8, 1>}]} {
    %c0_i32 = arith.constant 0 : i32
    %0 = arith.cmpi eq, %arg0, %c0_i32 : i32
    %1 = arith.extui %0 : i1 to i32
    %c0_i32_0 = arith.constant 0 : i32
    %2 = arith.cmpi ne, %1, %c0_i32_0 : i32
    scf.if %2 {
      %cst_16 = arith.constant 0.000000e+00 : f32
      %18 = vector.broadcast %cst_16 : f32 to vector<8x1xf32>
      %c0_17 = arith.constant 0 : index
      %c0_18 = arith.constant 0 : index
      %19 = vector.load %arg4[%c0_17, %c0_18] : memref<8x1xf32, #tpu.memory_space<vmem>>, vector<8x1xf32>
      tpu.vector_store %arg4[%c0_17, %c0_18], %18 {strides = array<i32>} : memref<8x1xf32, #tpu.memory_space<vmem>>, vector<8x1xf32>,
      %cst_19 = arith.constant 0.000000e+00 : f32
      %20 = vector.broadcast %cst_19 : f32 to vector<8x1xf32>
      %c0_20 = arith.constant 0 : index
      %c0_21 = arith.constant 0 : index
      %21 = vector.load %arg5[%c0_20, %c0_21] : memref<8x1xf32, #tpu.memory_space<vmem>>, vector<8x1xf32>
      tpu.vector_store %arg5[%c0_20, %c0_21], %20 {strides = array<i32>} : memref<8x1xf32, #tpu.memory_space<vmem>>, vector<8x1xf32>,
    } else {
    }
    %c0 = arith.constant 0 : index
    %c0_1 = arith.constant 0 : index
    %3 = vector.load %arg1[%c0, %c0_1] : memref<8x36xbf16, #tpu.memory_space<vmem>>, vector<8x36xbf16>
    %c0_2 = arith.constant 0 : index
    %c0_3 = arith.constant 0 : index
    %4 = vector.load %arg2[%c0_2, %c0_3] : memref<36x256xbf16, #tpu.memory_space<vmem>>, vector<36x256xbf16>
    %cst = arith.constant dense<0.000000e+00> : vector<8x256xf32>
    %5 = tpu.matmul %3, %4, %cst {dimension_numbers = #tpu.dot_dimension_numbers<[1], [0], [0], [1], [0, 0, 1, 1], [], []>} : vector<8x36xbf16>, vector<36x256xbf16>, vector<8x256xf32> -> vector<8x256xf32>
    %c0_4 = arith.constant 0 : index
    %c0_5 = arith.constant 0 : index
    %6 = vector.load %arg3[%c0_4, %c0_5] : memref<8x256xf32, #tpu.memory_space<vmem>>, vector<8x256xf32>
    tpu.vector_store %arg3[%c0_4, %c0_5], %5 {strides = array<i32>} : memref<8x256xf32, #tpu.memory_space<vmem>>, vector<8x256xf32>,
    %c0_6 = arith.constant 0 : index
    %c0_7 = arith.constant 0 : index
    %7 = vector.load %arg4[%c0_6, %c0_7] : memref<8x1xf32, #tpu.memory_space<vmem>>, vector<8x1xf32>
    %cst_8 = arith.constant dense<0.000000e+00> : vector<8xf32>
    %8 = vector.multi_reduction <add>, %5, %cst_8 [1] : vector<8x256xf32> to vector<8xf32>
    %9 = vector.shape_cast %8 : vector<8xf32> to vector<8x1xf32>
    %10 = arith.addf %7, %9 : vector<8x1xf32>
    %c0_9 = arith.constant 0 : index
    %c0_10 = arith.constant 0 : index
    %11 = vector.load %arg4[%c0_9, %c0_10] : memref<8x1xf32, #tpu.memory_space<vmem>>, vector<8x1xf32>
    tpu.vector_store %arg4[%c0_9, %c0_10], %10 {strides = array<i32>} : memref<8x1xf32, #tpu.memory_space<vmem>>, vector<8x1xf32>,
    %c0_11 = arith.constant 0 : index
    %c0_12 = arith.constant 0 : index
    %12 = vector.load %arg5[%c0_11, %c0_12] : memref<8x1xf32, #tpu.memory_space<vmem>>, vector<8x1xf32>
    %13 = arith.mulf %5, %5 : vector<8x256xf32>
    %cst_13 = arith.constant dense<0.000000e+00> : vector<8xf32>
    %14 = vector.multi_reduction <add>, %13, %cst_13 [1] : vector<8x256xf32> to vector<8xf32>
    %15 = vector.shape_cast %14 : vector<8xf32> to vector<8x1xf32>
    %16 = arith.addf %12, %15 : vector<8x1xf32>
    %c0_14 = arith.constant 0 : index
    %c0_15 = arith.constant 0 : index
    %17 = vector.load %arg5[%c0_14, %c0_15] : memref<8x1xf32, #tpu.memory_space<vmem>>, vector<8x1xf32>
    tpu.vector_store %arg5[%c0_14, %c0_15], %16 {strides = array<i32>} : memref<8x1xf32, #tpu.memory_space<vmem>>, vector<8x1xf32>,
    return
  }
  func.func @transform_0(%arg0: i32) -> (i32, i32) {
    %c0_i32 = arith.constant 0 : i32
    %c0_i32_0 = arith.constant 0 : i32
    %c0_i32_1 = arith.constant 0 : i32
    return %c0_i32, %c0_i32_0 : i32, i32
  }
  func.func @transform_1(%arg0: i32) -> (i32, i32) {
    %c0_i32 = arith.constant 0 : i32
    %c0_i32_0 = arith.constant 0 : i32
    return %c0_i32, %arg0 : i32, i32
  }
  func.func @transform_2(%arg0: i32) -> (i32, i32) {
    %c0_i32 = arith.constant 0 : i32
    %c0_i32_0 = arith.constant 0 : i32
    return %c0_i32, %arg0 : i32, i32
  }
  func.func @transform_3(%arg0: i32) -> (i32, i32) {
    %c0_i32 = arith.constant 0 : i32
    %c0_i32_0 = arith.constant 0 : i32
    %c0_i32_1 = arith.constant 0 : i32
    return %c0_i32, %c0_i32_0 : i32, i32
  }
  func.func @transform_4(%arg0: i32) -> (i32, i32) {
    %c0_i32 = arith.constant 0 : i32
    %c0_i32_0 = arith.constant 0 : i32
    %c0_i32_1 = arith.constant 0 : i32
    return %c0_i32, %c0_i32_0 : i32, i32
  }
}

module attributes {stable_mosaic.version = 11 : i64} {
  func.func @bn_relu_kernel(%arg0: i32, %arg1: memref<8x256xf32, #tpu.memory_space<vmem>>, %arg2: memref<8x1xf32, #tpu.memory_space<vmem>>, %arg3: memref<8x1xf32, #tpu.memory_space<vmem>>, %arg4: memref<8x1xf32, #tpu.memory_space<vmem>>, %arg5: memref<8x1xf32, #tpu.memory_space<vmem>>, %arg6: memref<8x256xf32, #tpu.memory_space<vmem>>) attributes {dimension_semantics = [#tpu.dimension_semantics<parallel>], iteration_bounds = array<i64: 2>, scalar_prefetch = 0 : i64, scratch_operands = 0 : i64, tpu.core_type = #tpu.core_type<tc>, window_params = [{transform_indices = @transform_0, window_bounds = array<i64: 8, 256>}, {pipeline_mode = #tpu.pipeline_mode<synchronous>, transform_indices = @transform_1, window_bounds = array<i64: 8, 1>}, {pipeline_mode = #tpu.pipeline_mode<synchronous>, transform_indices = @transform_2, window_bounds = array<i64: 8, 1>}, {pipeline_mode = #tpu.pipeline_mode<synchronous>, transform_indices = @transform_3, window_bounds = array<i64: 8, 1>}, {pipeline_mode = #tpu.pipeline_mode<synchronous>, transform_indices = @transform_4, window_bounds = array<i64: 8, 1>}, {transform_indices = @transform_5, window_bounds = array<i64: 8, 256>}]} {
    %c0 = arith.constant 0 : index
    %c0_0 = arith.constant 0 : index
    %0 = vector.load %arg2[%c0, %c0_0] : memref<8x1xf32, #tpu.memory_space<vmem>>, vector<8x1xf32>
    %cst = arith.constant 0.001953125 : f32
    %1 = vector.broadcast %cst : f32 to vector<8x1xf32>
    %2 = arith.mulf %0, %1 : vector<8x1xf32>
    %c0_1 = arith.constant 0 : index
    %c0_2 = arith.constant 0 : index
    %3 = vector.load %arg3[%c0_1, %c0_2] : memref<8x1xf32, #tpu.memory_space<vmem>>, vector<8x1xf32>
    %cst_3 = arith.constant 0.001953125 : f32
    %4 = vector.broadcast %cst_3 : f32 to vector<8x1xf32>
    %5 = arith.mulf %3, %4 : vector<8x1xf32>
    %6 = arith.mulf %2, %2 : vector<8x1xf32>
    %7 = arith.subf %5, %6 : vector<8x1xf32>
    %c0_4 = arith.constant 0 : index
    %c0_5 = arith.constant 0 : index
    %8 = vector.load %arg4[%c0_4, %c0_5] : memref<8x1xf32, #tpu.memory_space<vmem>>, vector<8x1xf32>
    %cst_6 = arith.constant 9.99999974E-6 : f32
    %9 = vector.broadcast %cst_6 : f32 to vector<8x1xf32>
    %10 = arith.addf %7, %9 : vector<8x1xf32>
    %11 = math.rsqrt %10 : vector<8x1xf32>
    %12 = arith.mulf %8, %11 : vector<8x1xf32>
    %c0_7 = arith.constant 0 : index
    %c0_8 = arith.constant 0 : index
    %13 = vector.load %arg5[%c0_7, %c0_8] : memref<8x1xf32, #tpu.memory_space<vmem>>, vector<8x1xf32>
    %14 = arith.mulf %2, %12 : vector<8x1xf32>
    %15 = arith.subf %13, %14 : vector<8x1xf32>
    %c0_9 = arith.constant 0 : index
    %c0_10 = arith.constant 0 : index
    %16 = vector.load %arg1[%c0_9, %c0_10] : memref<8x256xf32, #tpu.memory_space<vmem>>, vector<8x256xf32>
    %17 = vector.broadcast %12 : vector<8x1xf32> to vector<8x256xf32>
    %18 = arith.mulf %16, %17 : vector<8x256xf32>
    %19 = vector.broadcast %15 : vector<8x1xf32> to vector<8x256xf32>
    %20 = arith.addf %18, %19 : vector<8x256xf32>
    %cst_11 = arith.constant 0.000000e+00 : f32
    %21 = vector.broadcast %cst_11 : f32 to vector<8x256xf32>
    %22 = arith.maximumf %20, %21 : vector<8x256xf32>
    %c0_12 = arith.constant 0 : index
    %c0_13 = arith.constant 0 : index
    %23 = vector.load %arg6[%c0_12, %c0_13] : memref<8x256xf32, #tpu.memory_space<vmem>>, vector<8x256xf32>
    tpu.vector_store %arg6[%c0_12, %c0_13], %22 {strides = array<i32>} : memref<8x256xf32, #tpu.memory_space<vmem>>, vector<8x256xf32>,
    return
  }
  func.func @transform_0(%arg0: i32) -> (i32, i32) {
    %c0_i32 = arith.constant 0 : i32
    %c0_i32_0 = arith.constant 0 : i32
    return %c0_i32, %arg0 : i32, i32
  }
  func.func @transform_1(%arg0: i32) -> (i32, i32) {
    %c0_i32 = arith.constant 0 : i32
    %c0_i32_0 = arith.constant 0 : i32
    %c0_i32_1 = arith.constant 0 : i32
    return %c0_i32, %c0_i32_0 : i32, i32
  }
  func.func @transform_2(%arg0: i32) -> (i32, i32) {
    %c0_i32 = arith.constant 0 : i32
    %c0_i32_0 = arith.constant 0 : i32
    %c0_i32_1 = arith.constant 0 : i32
    return %c0_i32, %c0_i32_0 : i32, i32
  }
  func.func @transform_3(%arg0: i32) -> (i32, i32) {
    %c0_i32 = arith.constant 0 : i32
    %c0_i32_0 = arith.constant 0 : i32
    %c0_i32_1 = arith.constant 0 : i32
    return %c0_i32, %c0_i32_0 : i32, i32
  }
  func.func @transform_4(%arg0: i32) -> (i32, i32) {
    %c0_i32 = arith.constant 0 : i32
    %c0_i32_0 = arith.constant 0 : i32
    %c0_i32_1 = arith.constant 0 : i32
    return %c0_i32, %c0_i32_0 : i32, i32
  }
  func.func @transform_5(%arg0: i32) -> (i32, i32) {
    %c0_i32 = arith.constant 0 : i32
    %c0_i32_0 = arith.constant 0 : i32
    return %c0_i32, %arg0 : i32, i32
  }
}

module attributes {stable_mosaic.version = 11 : i64} {
  func.func @conv_stats_kernel(%arg0: i32, %arg1: memref<8x72xbf16, #tpu.memory_space<vmem>>, %arg2: memref<72x256xbf16, #tpu.memory_space<vmem>>, %arg3: memref<8x256xf32, #tpu.memory_space<vmem>>, %arg4: memref<8x1xf32, #tpu.memory_space<vmem>>, %arg5: memref<8x1xf32, #tpu.memory_space<vmem>>) attributes {dimension_semantics = [#tpu.dimension_semantics<arbitrary>], iteration_bounds = array<i64: 2>, scalar_prefetch = 0 : i64, scratch_operands = 0 : i64, tpu.core_type = #tpu.core_type<tc>, window_params = [{pipeline_mode = #tpu.pipeline_mode<synchronous>, transform_indices = @transform_0, window_bounds = array<i64: 8, 72>}, {transform_indices = @transform_1, window_bounds = array<i64: 72, 256>}, {transform_indices = @transform_2, window_bounds = array<i64: 8, 256>}, {pipeline_mode = #tpu.pipeline_mode<synchronous>, transform_indices = @transform_3, window_bounds = array<i64: 8, 1>}, {pipeline_mode = #tpu.pipeline_mode<synchronous>, transform_indices = @transform_4, window_bounds = array<i64: 8, 1>}]} {
    %c0_i32 = arith.constant 0 : i32
    %0 = arith.cmpi eq, %arg0, %c0_i32 : i32
    %1 = arith.extui %0 : i1 to i32
    %c0_i32_0 = arith.constant 0 : i32
    %2 = arith.cmpi ne, %1, %c0_i32_0 : i32
    scf.if %2 {
      %cst_16 = arith.constant 0.000000e+00 : f32
      %18 = vector.broadcast %cst_16 : f32 to vector<8x1xf32>
      %c0_17 = arith.constant 0 : index
      %c0_18 = arith.constant 0 : index
      %19 = vector.load %arg4[%c0_17, %c0_18] : memref<8x1xf32, #tpu.memory_space<vmem>>, vector<8x1xf32>
      tpu.vector_store %arg4[%c0_17, %c0_18], %18 {strides = array<i32>} : memref<8x1xf32, #tpu.memory_space<vmem>>, vector<8x1xf32>,
      %cst_19 = arith.constant 0.000000e+00 : f32
      %20 = vector.broadcast %cst_19 : f32 to vector<8x1xf32>
      %c0_20 = arith.constant 0 : index
      %c0_21 = arith.constant 0 : index
      %21 = vector.load %arg5[%c0_20, %c0_21] : memref<8x1xf32, #tpu.memory_space<vmem>>, vector<8x1xf32>
      tpu.vector_store %arg5[%c0_20, %c0_21], %20 {strides = array<i32>} : memref<8x1xf32, #tpu.memory_space<vmem>>, vector<8x1xf32>,
    } else {
    }
    %c0 = arith.constant 0 : index
    %c0_1 = arith.constant 0 : index
    %3 = vector.load %arg1[%c0, %c0_1] : memref<8x72xbf16, #tpu.memory_space<vmem>>, vector<8x72xbf16>
    %c0_2 = arith.constant 0 : index
    %c0_3 = arith.constant 0 : index
    %4 = vector.load %arg2[%c0_2, %c0_3] : memref<72x256xbf16, #tpu.memory_space<vmem>>, vector<72x256xbf16>
    %cst = arith.constant dense<0.000000e+00> : vector<8x256xf32>
    %5 = tpu.matmul %3, %4, %cst {dimension_numbers = #tpu.dot_dimension_numbers<[1], [0], [0], [1], [0, 0, 1, 1], [], []>} : vector<8x72xbf16>, vector<72x256xbf16>, vector<8x256xf32> -> vector<8x256xf32>
    %c0_4 = arith.constant 0 : index
    %c0_5 = arith.constant 0 : index
    %6 = vector.load %arg3[%c0_4, %c0_5] : memref<8x256xf32, #tpu.memory_space<vmem>>, vector<8x256xf32>
    tpu.vector_store %arg3[%c0_4, %c0_5], %5 {strides = array<i32>} : memref<8x256xf32, #tpu.memory_space<vmem>>, vector<8x256xf32>,
    %c0_6 = arith.constant 0 : index
    %c0_7 = arith.constant 0 : index
    %7 = vector.load %arg4[%c0_6, %c0_7] : memref<8x1xf32, #tpu.memory_space<vmem>>, vector<8x1xf32>
    %cst_8 = arith.constant dense<0.000000e+00> : vector<8xf32>
    %8 = vector.multi_reduction <add>, %5, %cst_8 [1] : vector<8x256xf32> to vector<8xf32>
    %9 = vector.shape_cast %8 : vector<8xf32> to vector<8x1xf32>
    %10 = arith.addf %7, %9 : vector<8x1xf32>
    %c0_9 = arith.constant 0 : index
    %c0_10 = arith.constant 0 : index
    %11 = vector.load %arg4[%c0_9, %c0_10] : memref<8x1xf32, #tpu.memory_space<vmem>>, vector<8x1xf32>
    tpu.vector_store %arg4[%c0_9, %c0_10], %10 {strides = array<i32>} : memref<8x1xf32, #tpu.memory_space<vmem>>, vector<8x1xf32>,
    %c0_11 = arith.constant 0 : index
    %c0_12 = arith.constant 0 : index
    %12 = vector.load %arg5[%c0_11, %c0_12] : memref<8x1xf32, #tpu.memory_space<vmem>>, vector<8x1xf32>
    %13 = arith.mulf %5, %5 : vector<8x256xf32>
    %cst_13 = arith.constant dense<0.000000e+00> : vector<8xf32>
    %14 = vector.multi_reduction <add>, %13, %cst_13 [1] : vector<8x256xf32> to vector<8xf32>
    %15 = vector.shape_cast %14 : vector<8xf32> to vector<8x1xf32>
    %16 = arith.addf %12, %15 : vector<8x1xf32>
    %c0_14 = arith.constant 0 : index
    %c0_15 = arith.constant 0 : index
    %17 = vector.load %arg5[%c0_14, %c0_15] : memref<8x1xf32, #tpu.memory_space<vmem>>, vector<8x1xf32>
    tpu.vector_store %arg5[%c0_14, %c0_15], %16 {strides = array<i32>} : memref<8x1xf32, #tpu.memory_space<vmem>>, vector<8x1xf32>,
    return
  }
  func.func @transform_0(%arg0: i32) -> (i32, i32) {
    %c0_i32 = arith.constant 0 : i32
    %c0_i32_0 = arith.constant 0 : i32
    %c0_i32_1 = arith.constant 0 : i32
    return %c0_i32, %c0_i32_0 : i32, i32
  }
  func.func @transform_1(%arg0: i32) -> (i32, i32) {
    %c0_i32 = arith.constant 0 : i32
    %c0_i32_0 = arith.constant 0 : i32
    return %c0_i32, %arg0 : i32, i32
  }
  func.func @transform_2(%arg0: i32) -> (i32, i32) {
    %c0_i32 = arith.constant 0 : i32
    %c0_i32_0 = arith.constant 0 : i32
    return %c0_i32, %arg0 : i32, i32
  }
  func.func @transform_3(%arg0: i32) -> (i32, i32) {
    %c0_i32 = arith.constant 0 : i32
    %c0_i32_0 = arith.constant 0 : i32
    %c0_i32_1 = arith.constant 0 : i32
    return %c0_i32, %c0_i32_0 : i32, i32
  }
  func.func @transform_4(%arg0: i32) -> (i32, i32) {
    %c0_i32 = arith.constant 0 : i32
    %c0_i32_0 = arith.constant 0 : i32
    %c0_i32_1 = arith.constant 0 : i32
    return %c0_i32, %c0_i32_0 : i32, i32
  }
}

</mosaic_0001>

<bundles_post_ra>
// kernel: conv_block_forward.5
= control target key start
LH: loop header
LB: loop body
LE: loop exit
PB: predicated region body
PF: predicated region fallthrough
CT: control target
= control target key end

     0   :  { %s379_s18 = smov 0   ;;  %s408_s0 = inlined_call_operand.vmem [shape: f32[8,512], index: 0, kind: input, shape index: {}]   ;;  %s409_s1 = inlined_call_operand.vmem [shape: f32[8,1], index: 1, kind: input, shape index: {}]   ;;  %s410_s2 = inlined_call_operand.vmem [shape: f32[8,1], index: 2, kind: input, shape index: {}]   ;;  %s411_s3 = inlined_call_operand.vmem [shape: f32[8,1], index: 3, kind: input, shape index: {}]   ;;  %s412_s4 = inlined_call_operand.vmem [shape: f32[8,1], index: 4, kind: input, shape index: {}]   ;;  %s413_s5 = inlined_call_operand.vmem [shape: f32[8,512], index: 5, kind: output, shape index: {}]  }
   0x1 LB: > { %s317_s19 = sadd.s32 4294967295, %s346_s18   ;;  %p321_p0 = scmp.ge.s32.totalorder %s346_s18, 1  ;;  %s346_s18 = sphi %s379_s18, %s15_s18  }
   0x2   : > { %p188_p1 = scmp.lt.s32.totalorder %s346_s18, 3 }
   0x4   : > { %p189_p2 = pnand %p321_p0, %p188_p1 }
   0x5   : > { %v228_v0 = vld [vmem:[%s409_s1] sm:$0xff] (!%p189_p2)  ;;  %v348_v2 = vmov (!%p189_p2), 0   ;;  %s322_s28 = sshll.u32 (!%p189_p2), %s317_s19, 1 }
   0x6   : > { %192 = sbr.rel (%p189_p2) target bundleno = 164 (0xa4), region = 40  ;;  %v230_v1 = vld [vmem:[%s410_s2] sm:$0xff] (!%p189_p2)  ;;  %337 = vset.pattern.permute.xlu0 (!%p189_p2), %v348_v2  ;;  %v229_v3 = vmul.f32 (!%p189_p2), 0.001953125, %v228_v0  ;;  %p217_p3 = scmp.lt.s32.totalorder (!%p189_p2), %s322_s28, 3 }
   0x7   : > { %v231_v4 = vmul.f32 (!%p189_p2), 0.001953125, %v230_v1  ;;  %v234_v8 = vld [vmem:[%s411_s3] sm:$0xff] (!%p189_p2) }
   0x8   : > { %v232_v5 = vmul.f32 (!%p189_p2), %v229_v3, %v229_v3  ;;  %v238_v11 = vld [vmem:[%s412_s4] sm:$0xff] (!%p189_p2) }
   0xa   : > { %v233_v6 = vsub.f32 (!%p189_p2), %v231_v4, %v232_v5 }
   0xc   : > { %v235_v7 = vadd.f32 (!%p189_p2), 1e-05, %v233_v6 }
   0xd   : > { %s415_s28 = smov (!%p217_p3, %s322_s28), 3 }
   0xe   : > { %338 = vrsqrt.f32 %v235_v7  ;;  %s323_s29 = sshll.u32 %s415_s28, 3 }
   0xf   : > { %s220_s7 = scalar_lea.vmem %s408_s0, %s323_s29  ;;  %s226_s10 = scalar_lea.vmem %s413_s5, %s323_s29 }
  0x10   : > { %v241_v15 = vld [vmem:[%s220_s7] sm:$0xff]  ;;  %v242_v16 = vld [vmem:[%s220_s7 + $0x8] sm:$0xff] }
  0x18   : > { %v339_v9 = vpop.eup %338 }
  0x19   : > { %v237_v10 = vmul.f32 %v339_v9, %v234_v8 }
  0x1b   : > { %245 = vperm.xlu0 %337, %v237_v10   ;;  %v239_v12 = vmul.f32 %v237_v10, %v229_v3 }
  0x1d   : > { %v240_v13 = vsub.f32 %v238_v11, %v239_v12 }
  0x1f   : > { %252 = vperm.xlu0 %337, %v240_v13  }
  0x9a   : > { %v246_v14 = vpop.permute.xlu0 %245 }
  0x9b   : > { %v248_v17 = vmul.f32 %v246_v14, %v241_v15  ;;  %v249_v18 = vmul.f32 %v246_v14, %v242_v16 }
  0x9e   : > { %v253_v19 = vpop.permute.xlu0 %252 }
  0x9f   : > { %v255_v20 = vadd.f32 %v253_v19, %v248_v17  ;;  %v256_v21 = vadd.f32 %v253_v19, %v249_v18 }
  0xa1   : > { %v257_v22 = vmax.f32 %v255_v20, 0.0  ;;  %v258_v23 = vmax.f32 %v256_v21, 0.0 }
  0xa3   : > { %259 = vst [vmem:[%s226_s10] sm:$0xff] %v257_v22  ;;  %260 = vst [vmem:[%s226_s10 + $0x8] sm:$0xff] %v258_v23 }
  0xa4 PF: > { %s15_s18 = sadd.s32 1, %s346_s18  }
  0xa5   : > { %p12_p4 = scmp.ge.s32.totalorder %s15_s18, 4  }
  0xa7   :  { %14 = sbr.rel (!%p12_p4) target bundleno = 1 (0x1), region = 70 }

// kernel: conv_block_forward.4
= control target key start
LH: loop header
LB: loop body
LE: loop exit
PB: predicated region body
PF: predicated region fallthrough
CT: control target
= control target key end

     0   :  { %s536_s15 = smov 0   ;;  %s538_s16 = smov 0   ;;  %s615_s0 = inlined_call_operand.vmem [shape: bf16[8,36], index: 0, kind: input, shape index: {}]   ;;  %s616_s1 = inlined_call_operand.vmem [shape: bf16[36,512], index: 1, kind: input, shape index: {}]   ;;  %s617_s2 = inlined_call_operand.vmem [shape: f32[8,512], index: 2, kind: output, shape index: {0}]   ;;  %s618_s3 = inlined_call_operand.vmem [shape: f32[8,1], index: 3, kind: output, shape index: {1}]   ;;  %s619_s4 = inlined_call_operand.vmem [shape: f32[8,1], index: 4, kind: output, shape index: {2}]  }
   0x1   :  { %s540_s17 = smov 0  }
   0x2 LB: > { %s428_s18 = sadd.s32 4294967295, %s507_s17   ;;  %s553_s19 = sadd.s32 1, %s507_s17   ;;  %s507_s17 = sphi %s540_s17, %s622_s17   ;;  %s503_s16 = sphi %s538_s16, %s621_s16   ;;  %s499_s15 = sphi %s536_s15, %s620_s15  }
   0x3   : > { %s40_s20 = ssub.s32 %s507_s17, %s553_s19  ;;  %s43_s21 = sadd.s32 1, %s503_s16 }
   0x4   : > { %p41_p0 = scmp.eq.s32.totalorder %s40_s20, 0  ;;  %p50_p1 = scmp.ne.s32.totalorder %s503_s16, %s499_s15 }
   0x5   : > { %p51_p2 = scmp.eq.s32.totalorder %s507_s17, 0  ;;  %p431_p4 = scmp.ge.s32.totalorder %s507_s17, 2 }
   0x6   : > { %s562_s22 = scalar_select %p41_p0, %s503_s16, %s43_s21  }
   0x7   : > { %p52_p3 = por %p51_p2, %p50_p1  ;;  %147 = sbr.rel (%p431_p4) target bundleno = 21 (0x15), region = 20 }
   0xe   : > { %150 = sbr.rel (!%p52_p3) target bundleno = 21 (0x15), region = 24  ;;  %s152_s23 = sand.u32 (%p52_p3), 1, %s503_s16  }
   0xf   : > { %s448_s24 = sshll.u32 (%p52_p3), %s507_s17, 3  ;;  %s449_s25 = smul.u32 (%p52_p3), 40, %s152_s23 }
  0x10   : > { %s157_s28 = scalar_lea.vmem (%p52_p3), %s616_s1, %s448_s24 }
  0x11   : > { %v193_v0 = vld [vmem:[%s157_s28] sm:$0xff] (%p52_p3)  ;;  %v195_v1 = vld [vmem:[%s157_s28 + $0x10] sm:$0xff] (%p52_p3)  ;;  %s154_s29 = scalar_lea.vmem (%p52_p3), [#allocation2], %s449_s25 }
  0x12   : > { %v197_v2 = vld [vmem:[%s157_s28 + $0x20] sm:$0xff] (%p52_p3)  ;;  %v199_v3 = vld [vmem:[%s157_s28 + $0x30] sm:$0xff] (%p52_p3)  ;;  %194 = vst [vmem:[%s154_s29] sm:$0xff] (%p52_p3), %v193_v0  ;;  %196 = vst [vmem:[%s154_s29 + $0x8] sm:$0xff] (%p52_p3), %v195_v1 }
  0x13   : > { %v201_v4 = vld [vmem:[%s157_s28 + $0x40] sm:$0xff] (%p52_p3)  ;;  %198 = vst [vmem:[%s154_s29 + $0x10] sm:$0xff] (%p52_p3), %v197_v2  ;;  %200 = vst [vmem:[%s154_s29 + $0x18] sm:$0xff] (%p52_p3), %v199_v3 }
  0x14   : > { %202 = vst [vmem:[%s154_s29 + $0x20] sm:$0xff] (%p52_p3), %v201_v4 }
  0x15 PF: > { %p434_p5 = scmp.ge.s32.totalorder %s507_s17, 1  ;;  %p207_p6 = scmp.lt.s32.totalorder %s507_s17, 3 }
  0x17   : > { %p208_p7 = pnand %p434_p5, %p207_p6 }
  0x18   : > { %s214_s30 = sand.u32 (!%p208_p7), 1, %s499_s15   ;;  %s435_s5 = sshll.u32 (!%p208_p7), %s428_s18, 1 }
  0x19   : > { %211 = sbr.rel (%p208_p7) target bundleno = 416 (0x1a0), region = 62  ;;  %p241_p8 = scmp.lt.s32.totalorder (!%p208_p7), %s435_s5, 3 }
  0x1a   : > { %s450_s6 = smul.u32 (!%p208_p7), 40, %s214_s30  ;;  %p437_p9 = scmp.ne.s32.totalorder (!%p208_p7), %s428_s18, 0 }
  0x1c   : > { %s216_s11 = scalar_lea.vmem (!%p208_p7), [#allocation2], %s450_s6 }
  0x20   : > { %s624_s5 = smov (!%p241_p8, %s435_s5), 3  ;;  %250 = sbr.rel (%p437_p9) target bundleno = 39 (0x27), region = 70 }
  0x21   : > { %s436_s7 = sshll.u32 %s624_s5, 3  ;;  %vm251_vm0 = vcmask (!%p437_p9), 7168   ;;  %v509_v5 = vmov (!%p437_p9), 0.0  }
  0x22   : > { %s578_s10 = scalar_lea.vmem %s617_s2, %s436_s7  ;;  %252 = vst.msk [vmem:[%s618_s3] sm:$0xff] (!%p437_p9), %vm251_vm0, %v509_v5  ;;  %253 = vst.msk [vmem:[%s619_s4] sm:$0xff] (!%p437_p9), %vm251_vm0, %v509_v5 }
  0x27 PF: > { %v477_v6 = vld [vmem:[%s216_s11 + $0x4] ss:$8 sps:$4 sm:$0xff]   ;;  %v479_v7 = vld [vmem:[%s216_s11] ss:$8 sps:$4 sm:$0xff]   ;;  %v510_v8 = vmov 0   ;;  %vm289_vm1 = vcmask 1041408  }
  0x28   : > { %328 = vmatprep.mubr.bf16.mxu0 %v510_v8  ;;  %296 = vmatprep.subr.bf16.mxu0 %v477_v6  ;;  %v480_v9 = vld [vmem:[%s216_s11 + $0x14] ss:$8 sps:$4 sm:$0xff]   ;;  %v259_v10 = vld [vmem:[%s216_s11 + $0x20] sm:$0x33]  ;;  %v482_v11 = vld [vmem:[%s216_s11 + $0x10] ss:$8 sps:$4 sm:$0xff]  }
  0x29   : > { %297 = vmatpush1.bf16.msra.mxu0 %v479_v7  ;;  %v443_v12 = vcombine.high %v259_v10, %v259_v10  ;;  %v442_v13 = vcombine.low %v259_v10, %v259_v10  ;;  %v254_v15 = vld [vmem:[%s615_s0] sm:$0xf]  ;;  %vm285_vm2 = vcmask 293888   ;;  %vm344_vm3 = vcmask 7168  }
  0x2a   : > { %298 = vmatprep.subr.bf16.mxu0 %v480_v9  ;;  %v339_v24 = vld [vmem:[%s618_s3] sm:$0xff] }
  0x2b   : > { %v291_v14 = vsel %vm289_vm1, %v442_v13, 0  ;;  %v346_v27 = vld [vmem:[%s619_s4] sm:$0xff] }
  0x2d   : > { %299 = vmatpush1.bf16.msra.mxu0 %v482_v11 }
  0x2e   : > { %444 = vmatprep.subr.msk.bf16.mxu0 %vm289_vm1, %v443_v12 }
  0x31   : > { %301 = vmatpush1.bf16.msra.mxu0 %v291_v14 }
  0x34   : > { %445 = vmatmul.mubr.msk.bf16.vlgmr.msra.gmra.mrb[0].mxu0 %vm285_vm2, %v254_v15 }
 0x107   : > { %v330_v16 = vpop.f32.mrb[0].mxu0 }
 0x108   : > { %337 = vst [vmem:[%s578_s10] sm:$0xff] %v330_v16  ;;  %v332_v17 = vpop.f32.mrb[1].mxu0  ;;  %v347_v18 = vmul.f32 %v330_v16, %v330_v16 }
 0x109   : > { %338 = vst [vmem:[%s578_s10 + $0x8] sm:$0xff] %v332_v17  ;;  %v334_v19 = vpop.f32.mrb[2].mxu0  ;;  %v340_v20 = vadd.f32 %v332_v17, %v330_v16  ;;  %v348_v21 = vmul.f32 %v332_v17, %v332_v17 }
 0x10a   : > { %v335_v22 = vpop.f32.mrb[3].mxu0 }
 0x10b   : > { %341 = vadd.xlane.f32.xlu0 %v340_v20  ;;  %v349_v23 = vadd.f32 %v348_v21, %v347_v18 }
 0x10f   : > { %350 = vadd.xlane.f32.xlu0 %v349_v23 }
 0x198   : > { %v342_v25 = vpop.xlane.xlu0 %341 }
 0x199   : > { %v343_v26 = vadd.f32 %v342_v25, %v339_v24 }
 0x19b   : > { %345 = vst.msk [vmem:[%s618_s3] sm:$0xff] %vm344_vm3, %v343_v26 }
 0x19c   : > { %v351_v28 = vpop.xlane.xlu0 %350 }
 0x19d   : > { %v352_v29 = vadd.f32 %v351_v28, %v346_v27 }
 0x19f   : > { %353 = vst.msk [vmem:[%s619_s4] sm:$0xff] %vm344_vm3, %v352_v29 }
 0x1a0 PF: > { %p12_p10 = scmp.ge.s32.totalorder %s553_s19, 4   ;;  %s620_s15 = smov %s503_s16 }
 0x1a1   : > { %s621_s16 = smov %s562_s22  ;;  %s622_s17 = smov %s553_s19 }
 0x1a2   :  { %14 = sbr.rel (!%p12_p10) target bundleno = 2 (0x2), region = 121 }

// kernel: conv_block_forward.6
= control target key start
LH: loop header
LB: loop body
LE: loop exit
PB: predicated region body
PF: predicated region fallthrough
CT: control target
= control target key end

     0   :  { %s586_s15 = smov 0   ;;  %s588_s16 = smov 0   ;;  %s665_s0 = inlined_call_operand.vmem [shape: bf16[8,72], index: 0, kind: input, shape index: {}]   ;;  %s666_s1 = inlined_call_operand.vmem [shape: bf16[72,512], index: 1, kind: input, shape index: {}]   ;;  %s667_s2 = inlined_call_operand.vmem [shape: f32[8,512], index: 2, kind: output, shape index: {0}]   ;;  %s668_s3 = inlined_call_operand.vmem [shape: f32[8,1], index: 3, kind: output, shape index: {1}]   ;;  %s669_s4 = inlined_call_operand.vmem [shape: f32[8,1], index: 4, kind: output, shape index: {2}]  }
   0x1   :  { %s590_s17 = smov 0  }
   0x2 LB: > { %s468_s18 = sadd.s32 4294967295, %s557_s17   ;;  %s603_s19 = sadd.s32 1, %s557_s17   ;;  %s557_s17 = sphi %s590_s17, %s672_s17   ;;  %s553_s16 = sphi %s588_s16, %s671_s16   ;;  %s549_s15 = sphi %s586_s15, %s670_s15  }
   0x3   : > { %s40_s20 = ssub.s32 %s557_s17, %s603_s19  ;;  %s43_s21 = sadd.s32 1, %s553_s16 }
   0x4   : > { %p41_p0 = scmp.eq.s32.totalorder %s40_s20, 0  ;;  %p50_p1 = scmp.ne.s32.totalorder %s553_s16, %s549_s15 }
   0x5   : > { %p51_p2 = scmp.eq.s32.totalorder %s557_s17, 0  ;;  %p471_p4 = scmp.ge.s32.totalorder %s557_s17, 2 }
   0x6   : > { %s612_s22 = scalar_select %p41_p0, %s553_s16, %s43_s21  }
   0x7   : > { %p52_p3 = por %p51_p2, %p50_p1  ;;  %147 = sbr.rel (%p471_p4) target bundleno = 23 (0x17), region = 20 }
   0xe   : > { %150 = sbr.rel (!%p52_p3) target bundleno = 23 (0x17), region = 24  ;;  %s152_s23 = sand.u32 (%p52_p3), 1, %s553_s16  }
   0xf   : > { %s492_s24 = sshll.u32 (%p52_p3), %s557_s17, 3  ;;  %s493_s25 = smul.u32 (%p52_p3), 72, %s152_s23 }
  0x10   : > { %s157_s28 = scalar_lea.vmem (%p52_p3), %s666_s1, %s492_s24 }
  0x11   : > { %v201_v0 = vld [vmem:[%s157_s28] sm:$0xff] (%p52_p3)  ;;  %v203_v1 = vld [vmem:[%s157_s28 + $0x10] sm:$0xff] (%p52_p3)  ;;  %s154_s29 = scalar_lea.vmem (%p52_p3), [#allocation2], %s493_s25 }
  0x12   : > { %v205_v2 = vld [vmem:[%s157_s28 + $0x20] sm:$0xff] (%p52_p3)  ;;  %v207_v3 = vld [vmem:[%s157_s28 + $0x30] sm:$0xff] (%p52_p3)  ;;  %202 = vst [vmem:[%s154_s29] sm:$0xff] (%p52_p3), %v201_v0  ;;  %204 = vst [vmem:[%s154_s29 + $0x8] sm:$0xff] (%p52_p3), %v203_v1 }
  0x13   : > { %v209_v4 = vld [vmem:[%s157_s28 + $0x40] sm:$0xff] (%p52_p3)  ;;  %v211_v5 = vld [vmem:[%s157_s28 + $0x50] sm:$0xff] (%p52_p3)  ;;  %206 = vst [vmem:[%s154_s29 + $0x10] sm:$0xff] (%p52_p3), %v205_v2  ;;  %208 = vst [vmem:[%s154_s29 + $0x18] sm:$0xff] (%p52_p3), %v207_v3 }
  0x14   : > { %210 = vst [vmem:[%s154_s29 + $0x20] sm:$0xff] (%p52_p3), %v209_v4  ;;  %212 = vst [vmem:[%s154_s29 + $0x28] sm:$0xff] (%p52_p3), %v211_v5  ;;  %v213_v6 = vld [vmem:[%s157_s28 + $0x60] sm:$0xff] (%p52_p3)  ;;  %v215_v7 = vld [vmem:[%s157_s28 + $0x70] sm:$0xff] (%p52_p3) }
  0x15   : > { %v217_v8 = vld [vmem:[%s157_s28 + $0x80] sm:$0xff]  ;;  %214 = vst [vmem:[%s154_s29 + $0x30] sm:$0xff] %v213_v6  ;;  %216 = vst [vmem:[%s154_s29 + $0x38] sm:$0xff] %v215_v7 }
  0x16   : > { %218 = vst [vmem:[%s154_s29 + $0x40] sm:$0xff] %v217_v8 }
  0x17 PF: > { %p474_p5 = scmp.ge.s32.totalorder %s557_s17, 1  ;;  %p223_p6 = scmp.lt.s32.totalorder %s557_s17, 3 }
  0x19   : > { %p224_p7 = pnand %p474_p5, %p223_p6 }
  0x1a   : > { %s230_s30 = sand.u32 (!%p224_p7), 1, %s549_s15   ;;  %s475_s5 = sshll.u32 (!%p224_p7), %s468_s18, 1 }
  0x1b   : > { %227 = sbr.rel (%p224_p7) target bundleno = 426 (0x1aa), region = 62  ;;  %p257_p8 = scmp.lt.s32.totalorder (!%p224_p7), %s475_s5, 3 }
  0x1c   : > { %s494_s6 = smul.u32 (!%p224_p7), 72, %s230_s30  ;;  %p477_p9 = scmp.ne.s32.totalorder (!%p224_p7), %s468_s18, 0 }
  0x1e   : > { %s232_s11 = scalar_lea.vmem (!%p224_p7), [#allocation2], %s494_s6 }
  0x22   : > { %s674_s5 = smov (!%p257_p8, %s475_s5), 3  ;;  %266 = sbr.rel (%p477_p9) target bundleno = 41 (0x29), region = 70 }
  0x23   : > { %s476_s7 = sshll.u32 %s674_s5, 3  ;;  %vm267_vm0 = vcmask (!%p477_p9), 7168   ;;  %v559_v9 = vmov (!%p477_p9), 0.0  }
  0x24   : > { %s628_s10 = scalar_lea.vmem %s667_s2, %s476_s7  ;;  %268 = vst.msk [vmem:[%s668_s3] sm:$0xff] (!%p477_p9), %vm267_vm0, %v559_v9  ;;  %269 = vst.msk [vmem:[%s669_s4] sm:$0xff] (!%p477_p9), %vm267_vm0, %v559_v9 }
  0x29 PF: > { %v521_v10 = vld [vmem:[%s232_s11 + $0x4] ss:$8 sps:$4 sm:$0xff]   ;;  %v523_v11 = vld [vmem:[%s232_s11] ss:$8 sps:$4 sm:$0xff]   ;;  %v560_v12 = vmov 0   ;;  %vm329_vm1 = vcmask 1043456  }
  0x2a   : > { %368 = vmatprep.mubr.bf16.mxu0 %v560_v12  ;;  %336 = vmatprep.subr.bf16.mxu0 %v521_v10  ;;  %v524_v13 = vld [vmem:[%s232_s11 + $0x14] ss:$8 sps:$4 sm:$0xff]   ;;  %v526_v14 = vld [vmem:[%s232_s11 + $0x10] ss:$8 sps:$4 sm:$0xff]   ;;  %v527_v15 = vld [vmem:[%s232_s11 + $0x24] ss:$8 sps:$4 sm:$0xff]  }
  0x2b   : > { %337 = vmatpush1.bf16.msra.mxu0 %v523_v11  ;;  %v529_v16 = vld [vmem:[%s232_s11 + $0x20] ss:$8 sps:$4 sm:$0xff]   ;;  %v530_v17 = vld [vmem:[%s232_s11 + $0x34] ss:$8 sps:$4 sm:$0xff]   ;;  %v532_v19 = vld [vmem:[%s232_s11 + $0x30] ss:$8 sps:$4 sm:$0xff]  }
  0x2c   : > { %338 = vmatprep.subr.bf16.mxu0 %v524_v13  ;;  %v279_v18 = vld [vmem:[%s232_s11 + $0x40] sm:$0xff]  ;;  %vm325_vm2 = vcmask 588800   ;;  %vm384_vm3 = vcmask 7168  }
  0x2d   : > { %v487_v20 = vcombine.high %v279_v18, %v279_v18  ;;  %v486_v21 = vcombine.low %v279_v18, %v279_v18  ;;  %v270_v23 = vld [vmem:[%s665_s0] sm:$0xf] }
  0x2e   : > { %v379_v32 = vld [vmem:[%s668_s3] sm:$0xff] }
  0x2f   : > { %339 = vmatpush1.bf16.msra.mxu0 %v526_v14  ;;  %v331_v22 = vsel %vm329_vm1, %v486_v21, 0  ;;  %v386_v35 = vld [vmem:[%s669_s4] sm:$0xff] }
  0x30   : > { %340 = vmatprep.subr.bf16.mxu0 %v527_v15 }
  0x33   : > { %341 = vmatpush1.bf16.msra.mxu0 %v529_v16 }
  0x34   : > { %342 = vmatprep.subr.bf16.mxu0 %v530_v17 }
  0x37   : > { %343 = vmatpush1.bf16.msra.mxu0 %v532_v19 }
  0x38   : > { %488 = vmatprep.subr.msk.bf16.mxu0 %vm329_vm1, %v487_v20 }
  0x3b   : > { %345 = vmatpush1.bf16.msra.mxu0 %v331_v22 }
  0x3e   : > { %489 = vmatmul.mubr.msk.bf16.vlgmr.msra.gmra.mrb[0].mxu0 %vm325_vm2, %v270_v23 }
 0x111   : > { %v370_v24 = vpop.f32.mrb[0].mxu0 }
 0x112   : > { %377 = vst [vmem:[%s628_s10] sm:$0xff] %v370_v24  ;;  %v372_v25 = vpop.f32.mrb[1].mxu0  ;;  %v387_v26 = vmul.f32 %v370_v24, %v370_v24 }
 0x113   : > { %378 = vst [vmem:[%s628_s10 + $0x8] sm:$0xff] %v372_v25  ;;  %v374_v27 = vpop.f32.mrb[2].mxu0  ;;  %v380_v28 = vadd.f32 %v372_v25, %v370_v24  ;;  %v388_v29 = vmul.f32 %v372_v25, %v372_v25 }
 0x114   : > { %v375_v30 = vpop.f32.mrb[3].mxu0 }
 0x115   : > { %381 = vadd.xlane.f32.xlu0 %v380_v28  ;;  %v389_v31 = vadd.f32 %v388_v29, %v387_v26 }
 0x119   : > { %390 = vadd.xlane.f32.xlu0 %v389_v31 }
 0x1a2   : > { %v382_v33 = vpop.xlane.xlu0 %381 }
 0x1a3   : > { %v383_v34 = vadd.f32 %v382_v33, %v379_v32 }
 0x1a5   : > { %385 = vst.msk [vmem:[%s668_s3] sm:$0xff] %vm384_vm3, %v383_v34 }
 0x1a6   : > { %v391_v36 = vpop.xlane.xlu0 %390 }
 0x1a7   : > { %v392_v37 = vadd.f32 %v391_v36, %v386_v35 }
 0x1a9   : > { %393 = vst.msk [vmem:[%s669_s4] sm:$0xff] %vm384_vm3, %v392_v37 }
 0x1aa PF: > { %p12_p10 = scmp.ge.s32.totalorder %s603_s19, 4   ;;  %s670_s15 = smov %s553_s16 }
 0x1ab   : > { %s671_s16 = smov %s612_s22  ;;  %s672_s17 = smov %s603_s19 }
 0x1ac   :  { %14 = sbr.rel (!%p12_p10) target bundleno = 2 (0x2), region = 121 }

</bundles_post_ra>
